<compile_context>
chip_gen: v6e
topology: v6e:2x2x1
jax: 0.10.0
libtpu: 0.0.40
codegen_flags: <defaults>
</compile_context>

<pallas_src>
import functools

import jax
import jax.numpy as jnp
from jax import lax
from jax.experimental import pallas as pl
from jax.experimental.pallas import tpu as pltpu

BN_EPS = 1e-5


def _make_fused_kernel(n_imgs, hw, eps):
    """Fused ReLU + tap-contraction conv + BN (stats + apply) kernel.

    Grid = (pass, image):
      pass 0, image i : y_i = W @ relu(xt_i)  (MXU), accumulate sum / sumsq
      pass 1, image i : out_i = y_i * scale + shift

    Refs per step:
      xt_ref : [1, n_taps, HW]   tap-stacked input for one image (VMEM)
      w_ref  : [C_out, n_taps]   conv weights, one aligned tile
      gb_ref : [C_out, 2]        column 0 = gamma, column 1 = beta
      o_ref  : [1, C_out, HW]    normalized output for one image
      y_scr  : [N, C_out, HW]    conv output for the whole batch (VMEM scratch)
      sum_scr/sumsq_scr : [C_out, 1]  per-channel running sum / sum of squares
    """
    m_total = float(n_imgs * hw)
    inv_m = 1.0 / m_total

    def kernel(xt_ref, w_ref, gb_ref, o_ref, y_scr, sum_scr, sumsq_scr):
        p = pl.program_id(0)  # 0: conv + stats, 1: BN apply
        i = pl.program_id(1)  # image index

        @pl.when(p == 0)
        def _conv_and_stats():
            @pl.when(i == 0)
            def _init():
                sum_scr[...] = jnp.zeros_like(sum_scr)
                sumsq_scr[...] = jnp.zeros_like(sumsq_scr)

            # ReLU hoisted: one lane-dense vmax over the whole tap block.
            xr = jnp.maximum(xt_ref[0], 0.0)                       # [n_taps, HW]
            # Tap contraction on the MXU (frees the VALU slot).
            y = jnp.dot(w_ref[...], xr,
                        preferred_element_type=jnp.float32)        # [C_out, HW]
            y_scr[i] = y
            sum_scr[...] += jnp.sum(y, axis=1, keepdims=True)
            sumsq_scr[...] += jnp.sum(y * y, axis=1, keepdims=True)

        @pl.when(p == 1)
        def _bn_apply():
            mean = sum_scr[...] * inv_m                            # [C_out, 1]
            # One-pass biased variance (what PyTorch BN uses to normalize).
            var = jnp.maximum(sumsq_scr[...] * inv_m - mean * mean, 0.0)
            inv = lax.rsqrt(var + eps)                             # EUP
            scale = gb_ref[:, 0:1] * inv                           # gamma * inv
            shift = gb_ref[:, 1:2] - mean * scale                  # beta - mean*scale
            o_ref[0] = y_scr[i] * scale + shift

    return kernel


@functools.partial(jax.jit, static_argnames=("kernel_size", "stride", "padding", "dilation"))
def relu_diconv_bn(x_nchw, weight_oihw, gamma, beta, *, kernel_size, stride, padding, dilation):
    """x_nchw: [N, C_in, H, W]; weight_oihw: [C_out, C_in, KH, KW]; returns NCHW."""
    n, c_in, h, w = x_nchw.shape
    c_out = weight_oihw.shape[0]
    kh = kw = kernel_size

    xf = x_nchw.astype(jnp.float32)
    x_pad = jnp.pad(xf, ((0, 0), (0, 0), (padding, padding), (padding, padding)))
    hp, wp = h + 2 * padding, w + 2 * padding
    hout = (hp - dilation * (kh - 1) - 1) // stride + 1
    wout = (wp - dilation * (kw - 1) - 1) // stride + 1
    hw = hout * wout
    n_taps = kh * kw * c_in

    # im2col-lite tap stacking (cheap XLA slices): xt[N, KH*KW*C_in, Hout*Wout],
    # tap index t = (ih*KW + iw)*C_in + ci.
    wins = []
    for ih in range(kh):
        for iw in range(kw):
            r0, c0 = ih * dilation, iw * dilation
            win = lax.slice(
                x_pad,
                (0, 0, r0, c0),
                (n, c_in, r0 + (hout - 1) * stride + 1, c0 + (wout - 1) * stride + 1),
                (1, 1, stride, stride),
            )
            wins.append(win.reshape(n, c_in, hw))
    xt = jnp.concatenate(wins, axis=1)                                  # [N, n_taps, HW]

    # [C_out, C_in, KH, KW] -> [C_out, KH, KW, C_in] -> [C_out, n_taps] (matches xt order).
    w2 = jnp.transpose(weight_oihw.astype(jnp.float32), (0, 2, 3, 1)).reshape(c_out, n_taps)
    gb = jnp.stack([gamma.astype(jnp.float32), beta.astype(jnp.float32)], axis=1)  # [C_out, 2]

    kernel = _make_fused_kernel(n, hw, BN_EPS)

    n_last = n - 1
    flops = 2 * n * hw * n_taps * c_out + 8 * n * hw * c_out
    bytes_accessed = 4 * (n * n_taps * hw + c_out * n_taps + 2 * c_out + n * c_out * hw)

    out_flat = pl.pallas_call(
        kernel,
        grid=(2, n),
        in_specs=[
            # Image i during pass 0; pinned to the last image during pass 1 so the
            # pass transition triggers no re-fetch.
            pl.BlockSpec((1, n_taps, hw), lambda p, i: (i * (1 - p) + n_last * p, 0, 0)),
            pl.BlockSpec((c_out, n_taps), lambda p, i: (0, 0)),   # weights, fetched once
            pl.BlockSpec((c_out, 2), lambda p, i: (0, 0)),        # [gamma | beta], fetched once
        ],
        # Pinned to block 0 during pass 0 (never flushed before it is written in
        # pass 1); block i during pass 1.
        out_specs=pl.BlockSpec((1, c_out, hw), lambda p, i: (i * p, 0, 0)),
        out_shape=jax.ShapeDtypeStruct((n, c_out, hw), jnp.float32),
        scratch_shapes=[
            pltpu.VMEM((n, c_out, hw), jnp.float32),   # whole-batch conv output
            pltpu.VMEM((c_out, 1), jnp.float32),       # per-channel sum
            pltpu.VMEM((c_out, 1), jnp.float32),       # per-channel sum of squares
        ],
        compiler_params=pltpu.CompilerParams(
            dimension_semantics=("arbitrary", "arbitrary"),
        ),
        cost_estimate=pl.CostEstimate(
            flops=int(flops), transcendentals=int(n * c_out),
            bytes_accessed=int(bytes_accessed)),
    )(xt, w2, gb)

    # [N, C_out, HW] -> NCHW is a free reshape (identical memory layout).
    return out_flat.reshape(n, c_out, hout, wout).astype(x_nchw.dtype)


def _reference(x_nchw, weight_oihw, gamma, beta, *, stride, padding, dilation):
    """Pure-JAX reference for validation."""
    y = lax.conv_general_dilated(
        jnp.maximum(x_nchw, 0.0), weight_oihw,
        window_strides=(stride, stride),
        padding=[(padding, padding), (padding, padding)],
        rhs_dilation=(dilation, dilation),
        dimension_numbers=("NCHW", "OIHW", "NCHW"),
        precision=lax.Precision.HIGHEST,
    )
    mean = jnp.mean(y, axis=(0, 2, 3), keepdims=True)
    var = jnp.mean((y - mean) ** 2, axis=(0, 2, 3), keepdims=True)
    g = gamma.reshape(1, -1, 1, 1)
    b = beta.reshape(1, -1, 1, 1)
    return (y - mean) * lax.rsqrt(var + BN_EPS) * g + b


if __name__ == "__main__":
    # Module config: ReLUDiConvBN(C_in=4, C_out=8, kernel_size=3, stride=1, padding=2, dilation=2)
    C_IN, C_OUT, KSIZE, STRIDE, PAD, DIL = 4, 8, 3, 1, 2, 2
    N, H, W = 2, 16, 16

    key = jax.random.PRNGKey(0)
    kx, kw_, kg, kb = jax.random.split(key, 4)
    x = jax.random.normal(kx, (N, C_IN, H, W), dtype=jnp.float32)
    weight = jax.random.normal(kw_, (C_OUT, C_IN, KSIZE, KSIZE), dtype=jnp.float32) * 0.1
    gamma = 1.0 + 0.1 * jax.random.normal(kg, (C_OUT,), dtype=jnp.float32)
    beta = 0.1 * jax.random.normal(kb, (C_OUT,), dtype=jnp.float32)

    out = relu_diconv_bn(x, weight, gamma, beta,
                         kernel_size=KSIZE, stride=STRIDE, padding=PAD, dilation=DIL)
    out = jax.block_until_ready(out)

    ref = _reference(x, weight, gamma, beta, stride=STRIDE, padding=PAD, dilation=DIL)
    assert out.shape == ref.shape == (N, C_OUT, H, W), (out.shape, ref.shape)
    max_err = float(jnp.max(jnp.abs(out - ref)))
    assert jnp.allclose(out, ref, atol=1e-3, rtol=1e-3), max_err

    print("KERNEL_OK")
</pallas_src>

<mosaic_0001>
module attributes {stable_mosaic.version = 11 : i64} {
  func.func @kernel(%arg0: i32, %arg1: i32, %arg2: memref<1x36x256xf32, #tpu.memory_space<vmem>>, %arg3: memref<8x36xf32, #tpu.memory_space<vmem>>, %arg4: memref<8x2xf32, #tpu.memory_space<vmem>>, %arg5: memref<1x8x256xf32, #tpu.memory_space<vmem>>, %arg6: memref<2x8x256xf32, #tpu.memory_space<vmem>>, %arg7: memref<8x1xf32, #tpu.memory_space<vmem>>, %arg8: memref<8x1xf32, #tpu.memory_space<vmem>>) attributes {dimension_semantics = [#tpu.dimension_semantics<arbitrary>, #tpu.dimension_semantics<arbitrary>], iteration_bounds = array<i64: 2, 2>, scalar_prefetch = 0 : i64, scratch_operands = 3 : i64, tpu.core_type = #tpu.core_type<tc>, window_params = [{transform_indices = @transform_0, window_bounds = array<i64: 1, 36, 256>}, {pipeline_mode = #tpu.pipeline_mode<synchronous>, transform_indices = @transform_1, window_bounds = array<i64: 8, 36>}, {pipeline_mode = #tpu.pipeline_mode<synchronous>, transform_indices = @transform_2, window_bounds = array<i64: 8, 2>}, {transform_indices = @transform_3, window_bounds = array<i64: 1, 8, 256>}]} {
    %c0_i32 = arith.constant 0 : i32
    %0 = arith.cmpi eq, %arg0, %c0_i32 : i32
    %1 = arith.extui %0 : i1 to i32
    %c0_i32_0 = arith.constant 0 : i32
    %2 = arith.cmpi ne, %1, %c0_i32_0 : i32
    scf.if %2 {
      %c0_i32_2 = arith.constant 0 : i32
      %6 = arith.cmpi eq, %arg1, %c0_i32_2 : i32
      %7 = arith.extui %6 : i1 to i32
      %c0_i32_3 = arith.constant 0 : i32
      %8 = arith.cmpi ne, %7, %c0_i32_3 : i32
      scf.if %8 {
        %cst_21 = arith.constant 0.000000e+00 : f32
        %30 = vector.broadcast %cst_21 : f32 to vector<8x1xf32>
        %c0_22 = arith.constant 0 : index
        %c0_23 = arith.constant 0 : index
        %31 = vector.load %arg7[%c0_22, %c0_23] : memref<8x1xf32, #tpu.memory_space<vmem>>, vector<8x1xf32>
        tpu.vector_store %arg7[%c0_22, %c0_23], %30 {strides = array<i32>} : memref<8x1xf32, #tpu.memory_space<vmem>>, vector<8x1xf32>,
        %cst_24 = arith.constant 0.000000e+00 : f32
        %32 = vector.broadcast %cst_24 : f32 to vector<8x1xf32>
        %c0_25 = arith.constant 0 : index
        %c0_26 = arith.constant 0 : index
        %33 = vector.load %arg8[%c0_25, %c0_26] : memref<8x1xf32, #tpu.memory_space<vmem>>, vector<8x1xf32>
        tpu.vector_store %arg8[%c0_25, %c0_26], %32 {strides = array<i32>} : memref<8x1xf32, #tpu.memory_space<vmem>>, vector<8x1xf32>,
      } else {
      }
      %c0 = arith.constant 0 : index
      %c0_4 = arith.constant 0 : index
      %c0_5 = arith.constant 0 : index
      %9 = vector.load %arg2[%c0, %c0_4, %c0_5] : memref<1x36x256xf32, #tpu.memory_space<vmem>>, vector<1x36x256xf32>
      %10 = vector.shape_cast %9 : vector<1x36x256xf32> to vector<36x256xf32>
      %cst = arith.constant 0.000000e+00 : f32
      %11 = vector.broadcast %cst : f32 to vector<36x256xf32>
      %12 = arith.maximumf %10, %11 : vector<36x256xf32>
      %c0_6 = arith.constant 0 : index
      %c0_7 = arith.constant 0 : index
      %13 = vector.load %arg3[%c0_6, %c0_7] : memref<8x36xf32, #tpu.memory_space<vmem>>, vector<8x36xf32>
      %cst_8 = arith.constant dense<0.000000e+00> : vector<8x256xf32>
      %14 = tpu.matmul %13, %12, %cst_8 {dimension_numbers = #tpu.dot_dimension_numbers<[1], [0], [0], [1], [0, 0, 1, 1], [], []>} : vector<8x36xf32>, vector<36x256xf32>, vector<8x256xf32> -> vector<8x256xf32>
      %15 = arith.index_cast %arg1 : i32 to index
      %c0_9 = arith.constant 0 : index
      %c0_10 = arith.constant 0 : index
      %16 = vector.load %arg6[%15, %c0_9, %c0_10] : memref<2x8x256xf32, #tpu.memory_space<vmem>>, vector<1x8x256xf32>
      %17 = vector.shape_cast %16 : vector<1x8x256xf32> to vector<8x256xf32>
      %18 = vector.shape_cast %14 : vector<8x256xf32> to vector<1x8x256xf32>
      tpu.vector_store %arg6[%15, %c0_9, %c0_10], %18 {strides = array<i32>} : memref<2x8x256xf32, #tpu.memory_space<vmem>>, vector<1x8x256xf32>,
      %c0_11 = arith.constant 0 : index
      %c0_12 = arith.constant 0 : index
      %19 = vector.load %arg7[%c0_11, %c0_12] : memref<8x1xf32, #tpu.memory_space<vmem>>, vector<8x1xf32>
      %cst_13 = arith.constant dense<0.000000e+00> : vector<8xf32>
      %20 = vector.multi_reduction <add>, %14, %cst_13 [1] : vector<8x256xf32> to vector<8xf32>
      %21 = vector.shape_cast %20 : vector<8xf32> to vector<8x1xf32>
      %22 = arith.addf %19, %21 : vector<8x1xf32>
      %c0_14 = arith.constant 0 : index
      %c0_15 = arith.constant 0 : index
      %23 = vector.load %arg7[%c0_14, %c0_15] : memref<8x1xf32, #tpu.memory_space<vmem>>, vector<8x1xf32>
      tpu.vector_store %arg7[%c0_14, %c0_15], %22 {strides = array<i32>} : memref<8x1xf32, #tpu.memory_space<vmem>>, vector<8x1xf32>,
      %c0_16 = arith.constant 0 : index
      %c0_17 = arith.constant 0 : index
      %24 = vector.load %arg8[%c0_16, %c0_17] : memref<8x1xf32, #tpu.memory_space<vmem>>, vector<8x1xf32>
      %25 = arith.mulf %14, %14 : vector<8x256xf32>
      %cst_18 = arith.constant dense<0.000000e+00> : vector<8xf32>
      %26 = vector.multi_reduction <add>, %25, %cst_18 [1] : vector<8x256xf32> to vector<8xf32>
      %27 = vector.shape_cast %26 : vector<8xf32> to vector<8x1xf32>
      %28 = arith.addf %24, %27 : vector<8x1xf32>
      %c0_19 = arith.constant 0 : index
      %c0_20 = arith.constant 0 : index
      %29 = vector.load %arg8[%c0_19, %c0_20] : memref<8x1xf32, #tpu.memory_space<vmem>>, vector<8x1xf32>
      tpu.vector_store %arg8[%c0_19, %c0_20], %28 {strides = array<i32>} : memref<8x1xf32, #tpu.memory_space<vmem>>, vector<8x1xf32>,
    } else {
    }
    %c1_i32 = arith.constant 1 : i32
    %3 = arith.cmpi eq, %arg0, %c1_i32 : i32
    %4 = arith.extui %3 : i1 to i32
    %c0_i32_1 = arith.constant 0 : i32
    %5 = arith.cmpi ne, %4, %c0_i32_1 : i32
    scf.if %5 {
      %c0 = arith.constant 0 : index
      %c0_2 = arith.constant 0 : index
      %6 = vector.load %arg7[%c0, %c0_2] : memref<8x1xf32, #tpu.memory_space<vmem>>, vector<8x1xf32>
      %cst = arith.constant 0.001953125 : f32
      %7 = vector.broadcast %cst : f32 to vector<8x1xf32>
      %8 = arith.mulf %6, %7 : vector<8x1xf32>
      %c0_3 = arith.constant 0 : index
      %c0_4 = arith.constant 0 : index
      %9 = vector.load %arg8[%c0_3, %c0_4] : memref<8x1xf32, #tpu.memory_space<vmem>>, vector<8x1xf32>
      %cst_5 = arith.constant 0.001953125 : f32
      %10 = vector.broadcast %cst_5 : f32 to vector<8x1xf32>
      %11 = arith.mulf %9, %10 : vector<8x1xf32>
      %12 = arith.mulf %8, %8 : vector<8x1xf32>
      %13 = arith.subf %11, %12 : vector<8x1xf32>
      %cst_6 = arith.constant 0.000000e+00 : f32
      %14 = vector.broadcast %cst_6 : f32 to vector<8x1xf32>
      %15 = arith.maximumf %13, %14 : vector<8x1xf32>
      %cst_7 = arith.constant 9.99999974E-6 : f32
      %16 = vector.broadcast %cst_7 : f32 to vector<8x1xf32>
      %17 = arith.addf %15, %16 : vector<8x1xf32>
      %18 = math.rsqrt %17 : vector<8x1xf32>
      %c0_8 = arith.constant 0 : index
      %c0_9 = arith.constant 0 : index
      %19 = vector.load %arg4[%c0_8, %c0_9] : memref<8x2xf32, #tpu.memory_space<vmem>>, vector<8x1xf32>
      %20 = arith.mulf %19, %18 : vector<8x1xf32>
      %c0_10 = arith.constant 0 : index
      %c1 = arith.constant 1 : index
      %21 = vector.load %arg4[%c0_10, %c1] : memref<8x2xf32, #tpu.memory_space<vmem>>, vector<8x1xf32>
      %22 = arith.mulf %8, %20 : vector<8x1xf32>
      %23 = arith.subf %21, %22 : vector<8x1xf32>
      %24 = arith.index_cast %arg1 : i32 to index
      %c0_11 = arith.constant 0 : index
      %c0_12 = arith.constant 0 : index
      %25 = vector.load %arg6[%24, %c0_11, %c0_12] : memref<2x8x256xf32, #tpu.memory_space<vmem>>, vector<1x8x256xf32>
      %26 = vector.shape_cast %25 : vector<1x8x256xf32> to vector<8x256xf32>
      %27 = vector.broadcast %20 : vector<8x1xf32> to vector<8x256xf32>
      %28 = arith.mulf %26, %27 : vector<8x256xf32>
      %29 = vector.broadcast %23 : vector<8x1xf32> to vector<8x256xf32>
      %30 = arith.addf %28, %29 : vector<8x256xf32>
      %c0_13 = arith.constant 0 : index
      %c0_14 = arith.constant 0 : index
      %c0_15 = arith.constant 0 : index
      %31 = vector.load %arg5[%c0_13, %c0_14, %c0_15] : memref<1x8x256xf32, #tpu.memory_space<vmem>>, vector<1x8x256xf32>
      %32 = vector.shape_cast %31 : vector<1x8x256xf32> to vector<8x256xf32>
      %33 = vector.shape_cast %30 : vector<8x256xf32> to vector<1x8x256xf32>
      tpu.vector_store %arg5[%c0_13, %c0_14, %c0_15], %33 {strides = array<i32>} : memref<1x8x256xf32, #tpu.memory_space<vmem>>, vector<1x8x256xf32>,
    } else {
    }
    return
  }
  func.func @transform_0(%arg0: i32, %arg1: i32) -> (i32, i32, i32) {
    %c1_i32 = arith.constant 1 : i32
    %0 = arith.subi %c1_i32, %arg0 : i32
    %1 = arith.muli %arg1, %0 : i32
    %c1_i32_0 = arith.constant 1 : i32
    %2 = arith.muli %c1_i32_0, %arg0 : i32
    %3 = arith.addi %1, %2 : i32
    %c0_i32 = arith.constant 0 : i32
    %c0_i32_1 = arith.constant 0 : i32
    %c0_i32_2 = arith.constant 0 : i32
    return %3, %c0_i32, %c0_i32_1 : i32, i32, i32
  }
  func.func @transform_1(%arg0: i32, %arg1: i32) -> (i32, i32) {
    %c0_i32 = arith.constant 0 : i32
    %c0_i32_0 = arith.constant 0 : i32
    %c0_i32_1 = arith.constant 0 : i32
    return %c0_i32, %c0_i32_0 : i32, i32
  }
  func.func @transform_2(%arg0: i32, %arg1: i32) -> (i32, i32) {
    %c0_i32 = arith.constant 0 : i32
    %c0_i32_0 = arith.constant 0 : i32
    %c0_i32_1 = arith.constant 0 : i32
    return %c0_i32, %c0_i32_0 : i32, i32
  }
  func.func @transform_3(%arg0: i32, %arg1: i32) -> (i32, i32, i32) {
    %0 = arith.muli %arg1, %arg0 : i32
    %c0_i32 = arith.constant 0 : i32
    %c0_i32_0 = arith.constant 0 : i32
    %c0_i32_1 = arith.constant 0 : i32
    return %0, %c0_i32, %c0_i32_0 : i32, i32, i32
  }
}

</mosaic_0001>

<bundles_post_ra>
// kernel: relu_diconv_bn.1
= control target key start
LH: loop header
LB: loop body
LE: loop exit
PB: predicated region body
PF: predicated region fallthrough
CT: control target
= control target key end

     0   :  { %s598_s12 = smov 0   ;;  %s600_s13 = smov 0   ;;  %s685_s0 = inlined_call_operand.vmem [shape: f32[2,36,256], index: 0, kind: input, shape index: {}]   ;;  %s686_s1 = inlined_call_operand.vmem [shape: f32[8,36], index: 1, kind: input, shape index: {}]   ;;  %s687_s2 = inlined_call_operand.vmem [shape: f32[8,2], index: 2, kind: input, shape index: {}]   ;;  %s688_s3 = inlined_call_operand.vmem [shape: f32[2,8,256], index: 3, kind: output, shape index: {}]  }
   0x1   :  { %s602_s14 = smov 0   ;;  %s604_s15 = smov 0  }
   0x2   :  { %s606_s16 = smov 0  }
   0x3 LB: > { %s22_s17 = sadd.s32 1, %s563_s14  ;;  %s25_s18 = sadd.s32 1, %s567_s15  ;;  %s571_s16 = sphi %s606_s16, %s13_s16   ;;  %s567_s15 = sphi %s604_s15, %s692_s15   ;;  %s563_s14 = sphi %s602_s14, %s691_s14   ;;  %s559_s13 = sphi %s600_s13, %s690_s13   ;;  %s555_s12 = sphi %s598_s12, %s689_s12  }
   0x4   : > { %p23_p0 = scmp.ge.s32.totalorder %s22_s17, 2  ;;  %p463_p1 = scmp.ge.s32.totalorder %s571_s16, 1 }
   0x5   : > { %p163_p2 = scmp.lt.s32.totalorder %s571_s16, 5 }
   0x6   : > { %s694_s17 = smov (%p23_p0, %s22_s17), 0  ;;  %s696_s18 = smov (!%p23_p0, %s25_s18), %s567_s15 }
   0x7   : > { %p164_p3 = pnand %p463_p1, %p163_p2  ;;  %p27_p4 = scmp.ge.s32.totalorder %s696_s18, 2 }
   0x8   : > { %s191_s19 = ssub.s32 (!%p164_p3), 1, %s559_s13  ;;  %s202_s20 = smul.u32 (!%p164_p3), %s555_s12, %s559_s13 }
   0x9   : > { %s698_s18 = smov (%p27_p4, %s696_s18), 0  ;;  %167 = sbr.rel (%p164_p3) target bundleno = 661 (0x295), region = 32 }
   0xa   : > { %s192_s21 = smul.u32 (!%p164_p3), %s555_s12, %s191_s19  ;;  %p203_p5 = scmp.lt.s32.totalorder (!%p164_p3), %s202_s20, 1 }
   0xb   : > { %p467_p7 = scmp.ne.s32.totalorder (!%p164_p3), %s559_s13, 0 }
   0xc   : > { %s193_s22 = sadd.s32 (!%p164_p3), %s559_s13, %s192_s21 }
   0xd   : > { %p194_p6 = scmp.lt.s32.totalorder (!%p164_p3), %s193_s22, 1 }
   0xe   : > { %s700_s20 = smov (!%p203_p5, %s202_s20), 1  ;;  %212 = sbr.rel (%p467_p7) target bundleno = 381 (0x17d), region = 36 }
   0xf   : > { %s702_s22 = smov (!%p194_p6, %s193_s22), 1  ;;  %s479_s23 = sshll.u32 %s700_s20, 4 }
  0x10   : > { %s482_s24 = smul.u32 80, %s702_s22  ;;  %s640_s27 = scalar_lea.vmem %s688_s3, %s479_s23 }
  0x11   : > { %p468_p8 = scmp.ne.s32.totalorder (!%p467_p7), %s555_s12, 0 }
  0x12   : > { %s645_s30 = scalar_lea.vmem %s685_s0, %s482_s24 }
  0x13   : > { %216 = sbr.rel (%p468_p8) target bundleno = 26 (0x1a), region = 40 }
  0x18   : > { %vm217_vm0 = vcmask 7168   ;;  %v573_v0 = vmov 0.0  }
  0x19   : > { %218 = vst.msk [vmem:[#allocation3] sm:$0xff] %vm217_vm0, %v573_v0  ;;  %219 = vst.msk [vmem:[#allocation4] sm:$0xff] %vm217_vm0, %v573_v0 }
  0x1a PF: > { %v229_v1 = vld [vmem:[%s645_s30 + $0x48] sm:$0xf]  ;;  %vm245_vm1 = vcmask 1043456   ;;  %v228_v2 = vld [vmem:[%s645_s30 + $0x40] sm:$0xf]  ;;  %v227_v3 = vld [vmem:[%s645_s30 + $0x38] sm:$0xff] }
  0x1b   : > { %v239_v4 = vmax.f32 %v229_v1, 0.0  ;;  %v238_v5 = vmax.f32 %v228_v2, 0.0  ;;  %v237_v6 = vmax.f32 %v227_v3, 0.0  ;;  %v226_v7 = vld [vmem:[%s645_s30 + $0x30] sm:$0xff]  ;;  %v225_v8 = vld [vmem:[%s645_s30 + $0x28] sm:$0xff]  ;;  %v224_v9 = vld [vmem:[%s645_s30 + $0x20] sm:$0xff] }
  0x1c   : > { %v236_v10 = vmax.f32 %v226_v7, 0.0  ;;  %v223_v11 = vld [vmem:[%s645_s30 + $0x18] sm:$0xff]  ;;  %v235_v12 = vmax.f32 %v225_v8, 0.0  ;;  %v222_v13 = vld [vmem:[%s645_s30 + $0x10] sm:$0xff]  ;;  %v234_v14 = vmax.f32 %v224_v9, 0.0  ;;  %v221_v15 = vld [vmem:[%s645_s30 + $0x8] sm:$0xff] }
  0x1d   : > { %469 = vmatprep.subr.msk.mxu0 %vm245_vm1, %v239_v4  ;;  %v574_v16 = vmov 0.0   ;;  %v233_v17 = vmax.f32 %v223_v11, 0.0  ;;  %v220_v18 = vld [vmem:[%s645_s30] sm:$0xff]  ;;  %v232_v19 = vmax.f32 %v222_v13, 0.0  ;;  %v231_v20 = vmax.f32 %v221_v15, 0.0  ;;  %s480_s6 = sshll.u32 %s555_s12, 4 }
  0x1e   : > { %470 = vmatpush1.msk.msra.mxu0 %vm245_vm1, %v238_v5  ;;  %316 = vmatprep.mubr.f32.mxu0 %v574_v16  ;;  %v230_v21 = vmax.f32 %v220_v18, 0.0  ;;  %v240_v22 = vld [vmem:[%s686_s1] sm:$0xff]  ;;  %vm241_vm2 = vcmask 293888   ;;  %s325_s7 = scalar_lea.vmem [#allocation2], %s480_s6  ;;  %vm333_vm3 = vcmask 7168  }
  0x1f   : > { %276 = vmatprep.subr.mxu0 %v237_v6 }
  0x20   : > { %277 = vmatpush1.msra.mxu0 %v236_v10  ;;  %v328_v29 = vld [vmem:[#allocation3] sm:$0xff]  ;;  %v335_v32 = vld [vmem:[#allocation4] sm:$0xff] }
  0x21   : > { %278 = vmatprep.subr.mxu0 %v235_v12 }
  0x22   : > { %279 = vmatpush1.msra.mxu0 %v234_v14 }
  0x23   : > { %280 = vmatprep.subr.mxu0 %v233_v17 }
  0x24   : > { %281 = vmatpush1.msra.mxu0 %v232_v19 }
  0x25   : > { %282 = vmatprep.subr.mxu0 %v231_v20 }
  0x26   : > { %283 = vmatpush1.msra.mxu0 %v230_v21 }
  0x27   : > { %471 = vmatmul.mubr.msk.f32.vlgmr.msra.gmra.mxu0 %vm241_vm2, %v240_v22 }
  0xe7   : > { %v318_v23 = vpop.f32.mrf.mxu0 }
  0xe8   : > { %326 = vst [vmem:[%s325_s7] sm:$0xff] %v318_v23  ;;  %v336_v27 = vmul.f32 %v318_v23, %v318_v23 }
  0xe9   : > { %v320_v24 = vpop.f32.mrf.mxu0 }
  0xea   : > { %327 = vst [vmem:[%s325_s7 + $0x8] sm:$0xff] %v320_v24  ;;  %v337_v25 = vmul.f32 %v320_v24, %v320_v24  ;;  %v329_v26 = vadd.f32 %v320_v24, %v318_v23 }
  0xec   : > { %330 = vadd.xlane.f32.xlu0 %v329_v26  ;;  %v338_v28 = vadd.f32 %v337_v25, %v336_v27 }
  0xf0   : > { %339 = vadd.xlane.f32.xlu0 %v338_v28 }
 0x175   : > { %v331_v30 = vpop.xlane.xlu0 %330 }
 0x176   : > { %v332_v31 = vadd.f32 %v331_v30, %v328_v29 }
 0x178   : > { %334 = vst.msk [vmem:[#allocation3] sm:$0xff] %vm333_vm3, %v332_v31 }
 0x179   : > { %v340_v33 = vpop.xlane.xlu0 %339 }
 0x17a   : > { %v341_v34 = vadd.f32 %v340_v33, %v335_v32 }
 0x17c   : > { %342 = vst.msk [vmem:[#allocation4] sm:$0xff] %vm333_vm3, %v341_v34 }
 0x17d PF: > { %p474_p9 = scmp.ne.s32.totalorder %s559_s13, 1 }
 0x17e   : > { %s577_s10 = smov (!%p474_p9), 1   ;;  %s481_s11 = sshll.u32 (!%p474_p9), %s555_s12, 4 }
 0x17f   : > { %346 = sbr.rel (%p474_p9) target bundleno = 661 (0x295), region = 44  ;;  %s366_s13 = scalar_lea.vmem (!%p474_p9), [#allocation2], %s481_s11 }
 0x184   : > { %v347_v35 = vld [vmem:[#allocation3] sm:$0xff]  ;;  %v349_v36 = vld [vmem:[#allocation4] sm:$0xff]  ;;  %v575_v39 = vmov 0   ;;  %v576_v44 = vmov 1  }
 0x185   : > { %v348_v37 = vmul.f32 0.001953125, %v347_v35  ;;  %v350_v38 = vmul.f32 0.001953125, %v349_v36  ;;  %528 = vset.pattern.permute.xlu0 %v575_v39  ;;  %529 = vset.pattern.permute.xlu1 %v576_v44  ;;  %v356_v45 = vld [vmem:[%s687_s2] sm:$0xff]  ;;  %v368_v52 = vld [vmem:[%s366_s13 + $0x8] sm:$0xff] }
 0x186   : > { %v367_v51 = vld [vmem:[%s366_s13] sm:$0xff] }
 0x187   : > { %v351_v40 = vmul.f32 %v348_v37, %v348_v37 }
 0x189   : > { %v352_v41 = vsub.f32 %v350_v38, %v351_v40 }
 0x18b   : > { %v353_v42 = vmax.f32 %v352_v41, 0.0 }
 0x18d   : > { %v354_v43 = vadd.f32 1e-05, %v353_v42 }
 0x18f   : > { %531 = vrsqrt.f32 %v354_v43 }
 0x19c   : > { %v532_v46 = vpop.eup %531 }
 0x19d   : > { %v357_v47 = vmul.f32 %v532_v46, %v356_v45 }
 0x19f   : > { %v358_v48 = vmul.f32 %v357_v47, %v348_v37 }
 0x1a1   : > { %360 = vrot.lane.b32.xlu0 %v358_v48, %s577_s10 }
 0x1a5   : > { %371 = vperm.xlu0 %528, %v357_v47  }
 0x1a9   : > { %530 = vset.pattern.permute.xlu0 %v576_v44 }
 0x213   : > { %v361_v49 = vpop.permute.xlu0 %360 }
 0x214   : > { %v363_v50 = vsub.f32 %v356_v45, %v361_v49 }
 0x216   : > { %378 = vperm.xlu1 %529, %v363_v50  }
 0x220   : > { %v372_v53 = vpop.permute.xlu0 %371 }
 0x221   : > { %v374_v54 = vmul.f32 %v372_v53, %v367_v51  ;;  %v375_v55 = vmul.f32 %v372_v53, %v368_v52 }
 0x291   : > { %v379_v56 = vpop.permute.xlu1 %378 }
 0x292   : > { %v381_v57 = vadd.f32 %v379_v56, %v374_v54  ;;  %v382_v58 = vadd.f32 %v379_v56, %v375_v55 }
 0x294   : > { %383 = vst [vmem:[%s640_s27] sm:$0xff] %v381_v57  ;;  %384 = vst [vmem:[%s640_s27 + $0x8] sm:$0xff] %v382_v58 }
 0x295 PF: > { %s13_s16 = sadd.s32 1, %s571_s16   ;;  %s689_s12 = smov %s563_s14 }
 0x296   : > { %p10_p10 = scmp.ge.s32.totalorder %s13_s16, 6   ;;  %s690_s13 = smov %s567_s15 }
 0x297   : > { %s691_s14 = smov %s694_s17  ;;  %s692_s15 = smov %s698_s18 }
 0x298   :  { %12 = sbr.rel (!%p10_p10) target bundleno = 3 (0x3), region = 76 }

</bundles_post_ra>
